<compile_context>
chip_gen: v7x
topology: tpu7x:2x2x1
jax: 0.10.0
libtpu: 0.0.40
codegen_flags: <defaults>
</compile_context>

<pallas_src>
import functools

import jax
import jax.numpy as jnp
from jax.experimental import pallas as pl
from jax.experimental.pallas import tpu as pltpu


def _valuator_kernel(x_ref, w1_ref, b1_ref, w2_ref, b2_ref, o_ref):
    # x_ref : (TM, D)  f32   row tile of feat_emb
    # w1_ref: (D, H)   bf16  first linear weight (transposed), H = 8*D, resident
    # b1_ref: (1, H)   f32
    # w2_ref: (H, 1)   bf16  second linear weight as an MXU column, resident
    # b2_ref: (1, 1)   f32   scalar, lives in SMEM
    # o_ref : (TM, 1)  f32   natural sublane-major output block
    x = x_ref[...].astype(jnp.bfloat16)                                  # bf16 MXU operands
    h = jnp.dot(x, w1_ref[...], preferred_element_type=jnp.float32)      # (TM, H) MXU
    h = jnp.maximum(h + b1_ref[...], 0.0)                                # bias + ReLU (VPU)
    # Width-1 second linear also on the MXU (bf16 push, f32 accumulate); the MXU
    # slots are ~idle at K=D=32, and the result comes out already (TM, 1).
    y = jnp.dot(h.astype(jnp.bfloat16), w2_ref[...],
                preferred_element_type=jnp.float32)                      # (TM, 1)
    o_ref[...] = (y + b2_ref[0, 0]).astype(o_ref.dtype)


def prepare_valuator_params(w1, b1, w2, b2):
    """One-time parameter prep (transpose / cast / reshape) so the per-call
    forward pays no weight-side HBM round trips.
    w1: (8D, D), b1: (8D,), w2: (1, 8D), b2: (1,)."""
    hdim, _ = w1.shape
    w1t = jnp.asarray(w1, jnp.float32).T.astype(jnp.bfloat16)                 # (D, H) bf16
    b1r = jnp.asarray(b1, jnp.float32).reshape(1, hdim)                       # (1, H) f32
    w2c = jnp.asarray(w2, jnp.float32).reshape(hdim, 1).astype(jnp.bfloat16)  # (H, 1) bf16
    b2r = jnp.asarray(b2, jnp.float32).reshape(1, 1)                          # (1, 1) f32
    return w1t, b1r, w2c, b2r


@functools.partial(jax.jit, static_argnames=("row_tile",))
def valuator_forward(feat_emb, w1t, b1r, w2c, b2r, *, row_tile=4096):
    """feat_emb: (N, D); prepared params from prepare_valuator_params.
    Returns pred_score: (N, 1) f32 — matches PyTorch Valuator.forward."""
    n, d = feat_emb.shape
    hdim = w1t.shape[1]

    # Row-tile choice:
    #  * tiny N (<= 256): one full block, no padding.
    #  * otherwise: at least 2 grid steps (so the "parallel" axis can shard
    #    across v7x's two TensorCores) and rt derived from N as a multiple of
    #    128 so padding waste is bounded to < 128 rows.
    if n <= 256:
        rt, n_pad = n, n
    else:
        num_steps = max(2, pl.cdiv(n, row_tile))
        rt = 128 * pl.cdiv(n, 128 * num_steps)
        n_pad = rt * pl.cdiv(n, rt)

    x = jnp.asarray(feat_emb, jnp.float32)
    if n_pad != n:
        x = jnp.pad(x, ((0, n_pad - n), (0, 0)))  # finite zero rows, sliced off below

    grid = (n_pad // rt,)
    out = pl.pallas_call(
        _valuator_kernel,
        out_shape=jax.ShapeDtypeStruct((n_pad, 1), jnp.float32),
        grid_spec=pl.GridSpec(
            grid=grid,
            in_specs=[
                pl.BlockSpec((rt, d), lambda i: (i, 0)),            # x row tile
                pl.BlockSpec((d, hdim), lambda i: (0, 0)),          # W1^T (resident)
                pl.BlockSpec((1, hdim), lambda i: (0, 0)),          # b1
                pl.BlockSpec((hdim, 1), lambda i: (0, 0)),          # w2 column (resident)
                pl.BlockSpec(memory_space=pltpu.MemorySpace.SMEM),  # b2 scalar
            ],
            out_specs=pl.BlockSpec((rt, 1), lambda i: (i, 0)),      # (N, 1) output blocks
        ),
        compiler_params=pltpu.CompilerParams(
            dimension_semantics=("parallel",),
            vmem_limit_bytes=32 * 1024 * 1024,  # headroom for big row tiles on v5e
        ),
    )(x, w1t, b1r, w2c, b2r)
    return out[:n]


def _init_params(key, embed_dim):
    """Deterministic synthetic init matching nn.Linear shapes
    (Kaiming-uniform-ish bounds like PyTorch's default)."""
    d = embed_dim
    h = 8 * d
    k1, k2, k3, k4 = jax.random.split(key, 4)
    bound1 = 1.0 / (d ** 0.5)
    bound2 = 1.0 / (h ** 0.5)
    w1 = jax.random.uniform(k1, (h, d), jnp.float32, -bound1, bound1)
    b1 = jax.random.uniform(k2, (h,), jnp.float32, -bound1, bound1)
    w2 = jax.random.uniform(k3, (1, h), jnp.float32, -bound2, bound2)
    b2 = jax.random.uniform(k4, (1,), jnp.float32, -bound2, bound2)
    return w1, b1, w2, b2


def _reference(feat_emb, w1, b1, w2, b2, *, quantize_like_kernel=False):
    x, wt, w2r = feat_emb, w1, w2
    if quantize_like_kernel:  # kernel runs both matmuls with bf16 operands, f32 acc
        x = x.astype(jnp.bfloat16).astype(jnp.float32)
        wt = wt.astype(jnp.bfloat16).astype(jnp.float32)
    h = jnp.maximum(x @ wt.T + b1, 0.0)
    if quantize_like_kernel:
        h = h.astype(jnp.bfloat16).astype(jnp.float32)
        w2r = w2r.astype(jnp.bfloat16).astype(jnp.float32)
    return h @ w2r.T + b2


if __name__ == "__main__":
    embed_dim = 32          # D
    n_nodes = 16            # small batch of node embeddings

    key = jax.random.PRNGKey(0)
    kx, kp, kx2 = jax.random.split(key, 3)
    feat_emb = jax.random.normal(kx, (n_nodes, embed_dim), jnp.float32)
    w1, b1, w2, b2 = _init_params(kp, embed_dim)
    params = prepare_valuator_params(w1, b1, w2, b2)   # one-time, not per-call

    # Single-step path (tiny N -> grid=(1,), no padding).
    pred = jax.block_until_ready(valuator_forward(feat_emb, *params))
    assert pred.shape == (n_nodes, 1)
    ref_q = _reference(feat_emb, w1, b1, w2, b2, quantize_like_kernel=True)
    ref_f = _reference(feat_emb, w1, b1, w2, b2)
    assert jnp.allclose(pred, ref_q, atol=2e-3, rtol=2e-3)   # matches bf16-operand math
    assert jnp.allclose(pred, ref_f, atol=5e-2, rtol=5e-2)   # close to full-f32 module

    # Tiled + padded path (grid > 1, N not a multiple of the row tile).
    n2 = 300
    feat_emb2 = jax.random.normal(kx2, (n2, embed_dim), jnp.float32)
    pred2 = jax.block_until_ready(
        valuator_forward(feat_emb2, *params, row_tile=128))
    assert pred2.shape == (n2, 1)
    ref2_q = _reference(feat_emb2, w1, b1, w2, b2, quantize_like_kernel=True)
    assert jnp.allclose(pred2, ref2_q, atol=2e-3, rtol=2e-3)

    # Default-tile path: n > 256 forces >= 2 grid steps (v7x dual-TC sharding).
    pred3 = jax.block_until_ready(valuator_forward(feat_emb2, *params))
    assert pred3.shape == (n2, 1)
    assert jnp.allclose(pred3, ref2_q, atol=2e-3, rtol=2e-3)

    print("KERNEL_OK")
</pallas_src>

<mosaic_0001>
module attributes {stable_mosaic.version = 11 : i64} {
  func.func @_valuator_kernel(%arg0: i32, %arg1: memref<16x32xf32, #tpu.memory_space<vmem>>, %arg2: memref<32x256xbf16, #tpu.memory_space<vmem>>, %arg3: memref<1x256xf32, #tpu.memory_space<vmem>>, %arg4: memref<256x1xbf16, #tpu.memory_space<vmem>>, %arg5: memref<1x1xf32, #tpu.memory_space<smem>>, %arg6: memref<16x1xf32, #tpu.memory_space<vmem>>) attributes {dimension_semantics = [#tpu.dimension_semantics<parallel>], iteration_bounds = array<i64: 1>, scalar_prefetch = 0 : i64, scratch_operands = 0 : i64, tpu.core_type = #tpu.core_type<tc>, window_params = [{transform_indices = @transform_0, window_bounds = array<i64: 16, 32>}, {pipeline_mode = #tpu.pipeline_mode<synchronous>, transform_indices = @transform_1, window_bounds = array<i64: 32, 256>}, {pipeline_mode = #tpu.pipeline_mode<synchronous>, transform_indices = @transform_2, window_bounds = array<i64: 1, 256>}, {pipeline_mode = #tpu.pipeline_mode<synchronous>, transform_indices = @transform_3, window_bounds = array<i64: 256, 1>}, {transform_indices = @transform_4, window_bounds = array<i64: 1, 1>}, {transform_indices = @transform_5, window_bounds = array<i64: 16, 1>}]} {
    %c0 = arith.constant 0 : index
    %c0_0 = arith.constant 0 : index
    %0 = vector.load %arg1[%c0, %c0_0] : memref<16x32xf32, #tpu.memory_space<vmem>>, vector<16x32xf32>
    %1 = arith.truncf %0 : vector<16x32xf32> to vector<16x32xbf16>
    %c0_1 = arith.constant 0 : index
    %c0_2 = arith.constant 0 : index
    %2 = vector.load %arg2[%c0_1, %c0_2] : memref<32x256xbf16, #tpu.memory_space<vmem>>, vector<32x256xbf16>
    %cst = arith.constant dense<0.000000e+00> : vector<16x256xf32>
    %3 = tpu.matmul %1, %2, %cst {dimension_numbers = #tpu.dot_dimension_numbers<[1], [0], [0], [1], [0, 0, 1, 1], [], []>} : vector<16x32xbf16>, vector<32x256xbf16>, vector<16x256xf32> -> vector<16x256xf32>
    %c0_3 = arith.constant 0 : index
    %c0_4 = arith.constant 0 : index
    %4 = vector.load %arg3[%c0_3, %c0_4] : memref<1x256xf32, #tpu.memory_space<vmem>>, vector<1x256xf32>
    %5 = vector.broadcast %4 : vector<1x256xf32> to vector<16x256xf32>
    %6 = arith.addf %3, %5 : vector<16x256xf32>
    %cst_5 = arith.constant 0.000000e+00 : f32
    %7 = vector.broadcast %cst_5 : f32 to vector<16x256xf32>
    %8 = arith.maximumf %6, %7 : vector<16x256xf32>
    %9 = arith.truncf %8 : vector<16x256xf32> to vector<16x256xbf16>
    %c0_6 = arith.constant 0 : index
    %c0_7 = arith.constant 0 : index
    %10 = vector.load %arg4[%c0_6, %c0_7] : memref<256x1xbf16, #tpu.memory_space<vmem>>, vector<256x1xbf16>
    %cst_8 = arith.constant dense<0.000000e+00> : vector<16x1xf32>
    %11 = tpu.matmul %9, %10, %cst_8 {dimension_numbers = #tpu.dot_dimension_numbers<[1], [0], [0], [1], [0, 0, 1, 1], [], []>} : vector<16x256xbf16>, vector<256x1xbf16>, vector<16x1xf32> -> vector<16x1xf32>
    %c0_9 = arith.constant 0 : index
    %c0_10 = arith.constant 0 : index
    %12 = memref.load %arg5[%c0_9, %c0_10] : memref<1x1xf32, #tpu.memory_space<smem>>
    %13 = vector.broadcast %12 : f32 to vector<16x1xf32>
    %14 = arith.addf %11, %13 : vector<16x1xf32>
    %c0_11 = arith.constant 0 : index
    %c0_12 = arith.constant 0 : index
    %15 = vector.load %arg6[%c0_11, %c0_12] : memref<16x1xf32, #tpu.memory_space<vmem>>, vector<16x1xf32>
    tpu.vector_store %arg6[%c0_11, %c0_12], %14 {strides = array<i32>} : memref<16x1xf32, #tpu.memory_space<vmem>>, vector<16x1xf32>,
    return
  }
  func.func @transform_0(%arg0: i32) -> (i32, i32) {
    %c0_i32 = arith.constant 0 : i32
    %c0_i32_0 = arith.constant 0 : i32
    return %arg0, %c0_i32 : i32, i32
  }
  func.func @transform_1(%arg0: i32) -> (i32, i32) {
    %c0_i32 = arith.constant 0 : i32
    %c0_i32_0 = arith.constant 0 : i32
    %c0_i32_1 = arith.constant 0 : i32
    return %c0_i32, %c0_i32_0 : i32, i32
  }
  func.func @transform_2(%arg0: i32) -> (i32, i32) {
    %c0_i32 = arith.constant 0 : i32
    %c0_i32_0 = arith.constant 0 : i32
    %c0_i32_1 = arith.constant 0 : i32
    return %c0_i32, %c0_i32_0 : i32, i32
  }
  func.func @transform_3(%arg0: i32) -> (i32, i32) {
    %c0_i32 = arith.constant 0 : i32
    %c0_i32_0 = arith.constant 0 : i32
    %c0_i32_1 = arith.constant 0 : i32
    return %c0_i32, %c0_i32_0 : i32, i32
  }
  func.func @transform_4(%arg0: i32) -> (i32, i32) {
    %c0_i32 = arith.constant 0 : i32
    %c0_i32_0 = arith.constant 0 : i32
    %c0_i32_1 = arith.constant 0 : i32
    return %c0_i32, %c0_i32_0 : i32, i32
  }
  func.func @transform_5(%arg0: i32) -> (i32, i32) {
    %c0_i32 = arith.constant 0 : i32
    %c0_i32_0 = arith.constant 0 : i32
    return %arg0, %c0_i32 : i32, i32
  }
}

</mosaic_0001>

<bundles_post_ra>
// kernel: valuator_forward.1
= control target key start
LH: loop header
LB: loop body
LE: loop exit
PB: predicated region body
PF: predicated region fallthrough
CT: control target
= control target key end

     0   :  { %v358_v1 = vmov 0   ;;  %vm61_vm0 = vcmask 261120   ;;  %v31_v24 = vlaneseq  ;;  %vm285_vm1 = vcmask 7168   ;;  %s467_s1 = inlined_call_operand.vmem [shape: bf16[32,256], index: 1, kind: input, shape index: {}]   ;;  %s468_s0 = inlined_call_operand.vmem [shape: f32[16,32], index: 0, kind: input, shape index: {}]   ;;  %s469_s3 = inlined_call_operand.vmem [shape: bf16[256,1], index: 3, kind: input, shape index: {}]   ;;  %s470_s2 = inlined_call_operand.vmem [shape: f32[1,256], index: 2, kind: input, shape index: {}]   ;;  %s471_s4 = inlined_call_operand.<no memory space> [shape: f32[1,1], index: 4, kind: input, shape index: {}]   ;;  %s472_s5 = inlined_call_operand.vmem [shape: f32[16,1], index: 5, kind: output, shape index: {}]  }
   0x1   :  { %v336_v0 = vld [vmem:[%s467_s1 + $0x4] ss:$8 sps:$4 sm:$0xff]   ;;  %97 = vmatprep.mubr.bf16.mxu0 %v358_v1  ;;  %v338_v2 = vld [vmem:[%s467_s1] ss:$8 sps:$4 sm:$0xff]   ;;  %v339_v3 = vld [vmem:[%s467_s1 + $0x14] ss:$8 sps:$4 sm:$0xff]   ;;  %v147_v46 = vstv %s471_s4 }
   0x2   :  { %65 = vmatprep.subr.bf16.mxu0 %v336_v0  ;;  %v341_v4 = vld [vmem:[%s467_s1 + $0x10] ss:$8 sps:$4 sm:$0xff]   ;;  %v22_v5 = vld [vmem:[%s468_s0] sm:$0xff]  ;;  %v23_v6 = vld [vmem:[%s468_s0 + $0x8] sm:$0xff]  ;;  %v32_v25 = vshrl.u32 %v31_v24, 7 }
   0x3   :  { %66 = vmatpush1.bf16.msra.mxu0 %v338_v2  ;;  %v342_v7 = vld [vmem:[%s469_s3 + $0x40] sm:$0xff]   ;;  %v24_v9 = vpack.c.bf16 %v23_v6, %v22_v5  ;;  %v344_v10 = vld [vmem:[%s469_s3 + $0x48] sm:$0xff]   ;;  %v346_v12 = vld [vmem:[%s469_s3 + $0x50] sm:$0xff]  }
   0x4   :  { %67 = vmatprep.subr.bf16.mxu0 %v339_v3  ;;  %v343_v8 = vld [vmem:[%s469_s3] sm:$0xff]   ;;  %313 = vmatprep.subr.bf16.mxu1 %v342_v7  ;;  %v345_v11 = vld [vmem:[%s469_s3 + $0x8] sm:$0xff]   ;;  %v347_v13 = vld [vmem:[%s469_s3 + $0x10] sm:$0xff]   ;;  %v33_v26 = vsub.s32 0, %v32_v25  ;;  %v37_v28 = vsub.s32 1, %v32_v25 }
   0x5   :  { %314 = vmatpush3.bf16.msra.mxu1 %v343_v8  ;;  %v348_v14 = vld [vmem:[%s469_s3 + $0x58] sm:$0xff]   ;;  %v350_v16 = vld [vmem:[%s469_s3 + $0x60] sm:$0xff]   ;;  %v352_v18 = vld [vmem:[%s469_s3 + $0x68] sm:$0xff]  }
   0x6   :  { %315 = vmatprep.subr.bf16.mxu1 %v344_v10  ;;  %v349_v15 = vld [vmem:[%s469_s3 + $0x18] sm:$0xff]   ;;  %v351_v17 = vld [vmem:[%s469_s3 + $0x20] sm:$0xff]   ;;  %v353_v19 = vld [vmem:[%s469_s3 + $0x28] sm:$0xff]  }
   0x7   :  { %68 = vmatpush1.bf16.msra.mxu0 %v341_v4  ;;  %v354_v20 = vld [vmem:[%s469_s3 + $0x70] sm:$0xff]   ;;  %v356_v22 = vld [vmem:[%s469_s3 + $0x78] sm:$0xff]   ;;  %v29_v27 = vld [vmem:[%s470_s2] sm:$0x3] }
   0x8   :  { %v355_v21 = vld [vmem:[%s469_s3 + $0x30] sm:$0xff]   ;;  %v357_v23 = vld [vmem:[%s469_s3 + $0x38] sm:$0xff]   ;;  %v34_v29 = vrot.slane %v29_v27, %v33_v26  ;;  %v38_v30 = vrot.slane %v29_v27, %v37_v28 }
   0x9   :  { %316 = vmatpush3.bf16.msra.mxu1 %v345_v11 }
   0xa   :  { %296 = vmatmul.mubr.msk.bf16.vlgmr.msra.gmra.mrb[0].mxu0 %vm61_vm0, %v24_v9  ;;  %317 = vmatprep.subr.bf16.mxu1 %v346_v12 }
   0xd   :  { %318 = vmatpush3.bf16.msra.mxu1 %v347_v13 }
   0xe   :  { %319 = vmatprep.subr.bf16.mxu1 %v348_v14 }
  0x11   :  { %320 = vmatpush3.bf16.msra.mxu1 %v349_v15 }
  0x12   :  { %321 = vmatprep.subr.bf16.mxu1 %v350_v16 }
  0x15   :  { %322 = vmatpush3.bf16.msra.mxu1 %v351_v17 }
  0x16   :  { %323 = vmatprep.subr.bf16.mxu1 %v352_v18 }
  0x19   :  { %324 = vmatpush3.bf16.msra.mxu1 %v353_v19 }
  0x1a   :  { %325 = vmatprep.subr.bf16.mxu1 %v354_v20 }
  0x1d   :  { %326 = vmatpush3.bf16.msra.mxu1 %v355_v21 }
  0x1e   :  { %327 = vmatprep.subr.bf16.mxu1 %v356_v22 }
  0x21   :  { %328 = vmatpush3.bf16.msra.mxu1 %v357_v23 }
  0xdd   :  { %v99_v31 = vpop.f32.mrb[0].mxu0 }
  0xde   :  { %v100_v32 = vadd.f32 %v99_v31, %v34_v29  ;;  %v101_v33 = vpop.f32.mrb[1].mxu0 }
  0xdf   :  { %v102_v34 = vadd.f32 %v101_v33, %v38_v30  ;;  %v103_v35 = vpop.f32.mrb[2].mxu0 }
  0xe0   :  { %v104_v36 = vadd.f32 %v103_v35, %v34_v29  ;;  %v105_v37 = vpop.f32.mrb[3].mxu0  ;;  %v108_v39 = vmax.f32 %v100_v32, 0.0 }
  0xe1   :  { %v106_v38 = vadd.f32 %v105_v37, %v38_v30  ;;  %v109_v41 = vmax.f32 %v102_v34, 0.0 }
  0xe2   :  { %v110_v40 = vmax.f32 %v104_v36, 0.0 }
  0xe3   :  { %v111_v42 = vmax.f32 %v106_v38, 0.0 }
  0xe4   :  { %v112_v43 = vpack.c.bf16 %v110_v40, %v108_v39 }
  0xe5   :  { %v113_v44 = vpack.c.bf16 %v111_v42, %v109_v41 }
  0xe7   :  { %276 = vmatprep.mubr.bf16.mxu1 %v113_v44 }
  0xe8   :  { %277 = vmatmul.mubr.bf16.vlgmr.msra.gmra.mrb[0].mxu1 %v112_v43 }
 0x1bb   :  { %v329_v45 = vpop.f32.mrb[0].mxu1 }
 0x1bc   :  { %v330_v47 = vpop.f32.mrb[1].mxu1 }
 0x1bd   :  { %v331_v48 = vadd.f32 %v330_v47, %v329_v45  ;;  %v332_v49 = vpop.f32.mrb[2].mxu1 }
 0x1be   :  { %v333_v50 = vpop.f32.mrb[3].mxu1 }
 0x1bf   :  { %v279_v51 = vadd.f32 %v331_v48, %v147_v46  ;;  %v334_v52 = vadd.f32 %v333_v50, %v332_v49 }
 0x1c1   :  { %286 = vst.msk [vmem:[%s472_s5] sm:$0xff] %vm285_vm1, %v279_v51  ;;  %v282_v53 = vadd.f32 %v334_v52, %v147_v46 }
 0x1c3   :  { %287 = vst.msk [vmem:[%s472_s5 + $0x8] sm:$0xff] %vm285_vm1, %v282_v53 }

</bundles_post_ra>
